<compile_context>
chip_gen: v5e
topology: v5e:2x2
jax: 0.10.0
libtpu: 0.0.40
codegen_flags: <defaults>
</compile_context>

<pallas_src>
import jax
import jax.numpy as jnp
from jax.experimental import pallas as pl
from jax.experimental.pallas import tpu as pltpu

HIDDEN = 128    # config.hidden_size stand-in (128 -> lane-dense pooling/pooler/fc1)
FC1_DIM = 512
OUT_DIM = 7
OUT_PAD = 128   # lane-dense padded logits width (sliced back to OUT_DIM in wrapper)
VOCAB = 100
VPAD = 128      # vocab rounded up to 128 lanes for the in-kernel one-hot gather


def _round_up(x, m):
    return ((x + m - 1) // m) * m


def _vmem_capacity_bytes():
    try:
        cap = int(getattr(pltpu.get_tpu_info(), "vmem_capacity_bytes", 0))
        if cap > 0:
            return cap
    except Exception:
        pass
    return 64 * 1024 * 1024  # conservative fallback = v7x per-TC VMEM


def _choose_tiling(B, S):
    """Pick (batch_tile, padded_batch, vmem_limit_bytes) from the chip's VMEM."""
    cap = _vmem_capacity_bytes()                       # 128 MiB v5e/v6e, 64 MiB v7x
    vmem_limit = min(cap * 3 // 4, 100 * 1024 * 1024)  # leave headroom below physical
    budget = vmem_limit * 3 // 4                       # headroom for compiler temps

    # Constant-index_map (resident) blocks are still double-buffered -> count at 2x.
    weight_bytes = 2 * (4 * VPAD * HIDDEN                                        # embed f32
                        + 2 * (HIDDEN * HIDDEN + HIDDEN * FC1_DIM + FC1_DIM * OUT_PAD)  # bf16 W
                        + 4 * (HIDDEN + FC1_DIM + OUT_PAD))                      # f32 biases
    # Streamed blocks (double-buffered) + in-kernel intermediates, per batch row.
    per_row = (2 * 4 * S                 # ids (int32, x2 buffers)
               + 2 * 4 * S               # mask (int32, x2 buffers)
               + 2 * 2 * OUT_PAD         # bf16 logits block (x2 buffers)
               + 2 * 4 * S * VPAD        # one-hot contribution temps (f32)
               + 4 * (VPAD + 3 * HIDDEN)  # counts, pooled_in, pooled (+ bf16 copies)
               + 6 * FC1_DIM             # h1 f32 + bf16 copy
               + 4 * OUT_PAD)            # f32 logits before final cast
    tb = max(16, (budget - weight_bytes) // per_row)
    tb = min(tb, 2048)

    b_pad = _round_up(B, 16)             # sublane-packing friendly for the bf16 output
    if b_pad >= 32:
        tb = min(tb, b_pad // 2)         # >=2 grid steps -> both v7x TensorCores get work
    tb = min(tb, b_pad)
    tb = (tb // 128) * 128 if tb >= 128 else max(16, (tb // 16) * 16)
    b_pad = _round_up(B, tb)
    return int(tb), int(b_pad), int(vmem_limit)


def _gelu_tanh(x):
    # tanh-approximate GELU in f32; jnp.tanh lowers to the EUP slot (separate VLIW
    # slot from the VALU/MXU). Not bit-identical to PyTorch's exact-erf nn.GELU()
    # (~1e-3 max abs err).
    c = 0.7978845608028654  # sqrt(2/pi)
    return 0.5 * x * (1.0 + jnp.tanh(c * (x + 0.044715 * x * x * x)))


def mm_head_kernel(ids_ref, mask_ref, emb_ref, wp_ref, bp_ref,
                   w1_ref, b1_ref, w2_ref, b2_ref, out_ref):
    ids = ids_ref[...]                               # (TB, S) int32
    maskf = mask_ref[...].astype(jnp.float32)        # (TB, S)
    tb, s = ids.shape

    # Stand-in backbone: attention-mask-weighted mean pool fused with the embedding
    # gather, expressed as (weighted one-hot counts) @ table -> exact gather, no
    # (B,S,H) activation stream from HBM.
    denom = jnp.sum(maskf, axis=1, keepdims=True)                 # (TB, 1)
    inv = pl.reciprocal(jnp.maximum(denom, 1.0), approx=True)     # EUP; all-pad rows safe
    w = maskf * inv                                               # (TB, S)

    vocab_iota = jax.lax.broadcasted_iota(jnp.int32, (tb, s, VPAD), 2)
    contrib = jnp.where(ids[:, :, None] == vocab_iota, w[:, :, None], 0.0)
    counts = jnp.sum(contrib, axis=1)                             # (TB, VPAD)
    pooled_in = jnp.dot(counts, emb_ref[...],
                        preferred_element_type=jnp.float32)       # (TB, H)

    # tanh pooler (f32 elementwise; bf16 MXU operands, f32 accumulate).
    pooled = jnp.tanh(
        jnp.dot(pooled_in.astype(jnp.bfloat16), wp_ref[...],
                preferred_element_type=jnp.float32) + bp_ref[...])  # (TB, H)

    # Head: logits = fc2(GELU(fc1(pooled))).
    h1 = _gelu_tanh(
        jnp.dot(pooled.astype(jnp.bfloat16), w1_ref[...],
                preferred_element_type=jnp.float32) + b1_ref[...])  # (TB, 512) f32

    out = (jnp.dot(h1.astype(jnp.bfloat16), w2_ref[...],
                   preferred_element_type=jnp.float32) + b2_ref[...])  # (TB, 128)
    out_ref[...] = out.astype(out_ref.dtype)          # lane-dense bf16 writeback


def init_params(key):
    ks = jax.random.split(key, 7)

    def linear(kw, kb, fan_in, fan_out):
        bound = 1.0 / (fan_in ** 0.5)
        w = jax.random.uniform(kw, (fan_in, fan_out), jnp.float32, -bound, bound)
        b = jax.random.uniform(kb, (1, fan_out), jnp.float32, -bound, bound)
        return w, b

    embed = jax.random.normal(ks[0], (VOCAB, HIDDEN), jnp.float32) * 0.02
    # Zero-pad vocab to 128 rows once -> the in-kernel one-hot gather is lane-dense;
    # token ids are always < VOCAB so the padded rows are never selected.
    embed_pad = jnp.zeros((VPAD, HIDDEN), jnp.float32).at[:VOCAB].set(embed)

    w_pool, b_pool = linear(ks[1], ks[2], HIDDEN, HIDDEN)
    w1, b1 = linear(ks[3], ks[4], HIDDEN, FC1_DIM)
    w2, b2 = linear(ks[5], ks[6], FC1_DIM, OUT_DIM)
    # Zero-pad fc2 to 128 output lanes once -> unmasked lane-dense stores in-kernel.
    w2_pad = jnp.zeros((FC1_DIM, OUT_PAD), jnp.float32).at[:, :OUT_DIM].set(w2)
    b2_pad = jnp.zeros((1, OUT_PAD), jnp.float32).at[:, :OUT_DIM].set(b2)

    return dict(
        embed_pad=embed_pad,                                # f32 (exact gather, resident)
        w_pool=w_pool.astype(jnp.bfloat16), b_pool=b_pool,  # bf16 MXU operand, f32 bias
        w1=w1.astype(jnp.bfloat16), b1=b1,
        w2_pad=w2_pad.astype(jnp.bfloat16), b2_pad=b2_pad,
    )


def mm_regressor_forward(params, input_ids, attention_mask):
    B, S = input_ids.shape
    TB, B_pad, vmem_limit = _choose_tiling(B, S)

    ids = input_ids.astype(jnp.int32)
    mask = attention_mask.astype(jnp.int32)
    if B_pad != B:
        # Only the tiny int32 id/mask arrays are padded (padded rows have mask==0 and
        # are clamped in-kernel); no full activation tensor is ever copied in HBM.
        ids = jnp.pad(ids, ((0, B_pad - B), (0, 0)))
        mask = jnp.pad(mask, ((0, B_pad - B), (0, 0)))

    flops = 2 * B_pad * (S * VPAD            # weighted one-hot accumulation
                         + VPAD * HIDDEN     # gather-as-matmul
                         + HIDDEN * HIDDEN   # tanh pooler
                         + HIDDEN * FC1_DIM  # fc1
                         + FC1_DIM * OUT_PAD)  # fc2 (padded)
    transcendentals = B_pad * (1 + HIDDEN + FC1_DIM)
    bytes_accessed = (2 * 4 * B_pad * S + 2 * B_pad * OUT_PAD
                      + 4 * VPAD * HIDDEN
                      + 2 * (HIDDEN * HIDDEN + HIDDEN * FC1_DIM + FC1_DIM * OUT_PAD)
                      + 4 * (HIDDEN + FC1_DIM + OUT_PAD))

    out_pad = pl.pallas_call(
        mm_head_kernel,
        out_shape=jax.ShapeDtypeStruct((B_pad, OUT_PAD), jnp.bfloat16),
        grid=(B_pad // TB,),
        in_specs=[
            pl.BlockSpec((TB, S), lambda b: (b, 0)),             # input_ids (streamed)
            pl.BlockSpec((TB, S), lambda b: (b, 0)),             # attention_mask (streamed)
            pl.BlockSpec((VPAD, HIDDEN), lambda b: (0, 0)),      # embedding table (resident)
            pl.BlockSpec((HIDDEN, HIDDEN), lambda b: (0, 0)),    # w_pool (resident)
            pl.BlockSpec((1, HIDDEN), lambda b: (0, 0)),         # b_pool
            pl.BlockSpec((HIDDEN, FC1_DIM), lambda b: (0, 0)),   # w1
            pl.BlockSpec((1, FC1_DIM), lambda b: (0, 0)),        # b1
            pl.BlockSpec((FC1_DIM, OUT_PAD), lambda b: (0, 0)),  # w2 (zero-padded)
            pl.BlockSpec((1, OUT_PAD), lambda b: (0, 0)),        # b2 (zero-padded)
        ],
        out_specs=pl.BlockSpec((TB, OUT_PAD), lambda b: (b, 0)),
        compiler_params=pltpu.CompilerParams(
            dimension_semantics=("parallel",),       # >=2 steps -> both v7x TCs used
            vmem_limit_bytes=vmem_limit,
        ),
        cost_estimate=pl.CostEstimate(flops=flops,
                                      transcendentals=transcendentals,
                                      bytes_accessed=bytes_accessed),
    )(ids, mask, params["embed_pad"], params["w_pool"], params["b_pool"],
      params["w1"], params["b1"], params["w2_pad"], params["b2_pad"])

    logits = out_pad[:B, :OUT_DIM].astype(jnp.float32)
    # The PyTorch forward evaluates the (deterministic, eval-mode) backbone + head
    # twice on identical inputs; results are identical, so one launch serves both.
    return logits, logits


if __name__ == "__main__":
    key = jax.random.PRNGKey(0)
    k_param, k_ids = jax.random.split(key)

    B, S = 2, 8
    params = init_params(k_param)
    input_ids = jax.random.randint(k_ids, (B, S), 0, VOCAB, dtype=jnp.int32)
    lengths = jnp.array([S, S - 2], dtype=jnp.int32)
    attention_mask = (jnp.arange(S)[None, :] < lengths[:, None]).astype(jnp.int32)

    logits1, logits2 = jax.jit(mm_regressor_forward)(params, input_ids, attention_mask)
    jax.block_until_ready((logits1, logits2))

    assert logits1.shape == (B, OUT_DIM) and logits2.shape == (B, OUT_DIM)
    assert bool(jnp.all(jnp.isfinite(logits1)))
    print("KERNEL_OK")
</pallas_src>

<mosaic_0001>
module attributes {stable_mosaic.version = 11 : i64} {
  func.func @mm_head_kernel(%arg0: i32, %arg1: memref<16x8xi32, #tpu.memory_space<vmem>>, %arg2: memref<16x8xi32, #tpu.memory_space<vmem>>, %arg3: memref<128x128xf32, #tpu.memory_space<vmem>>, %arg4: memref<128x128xbf16, #tpu.memory_space<vmem>>, %arg5: memref<1x128xf32, #tpu.memory_space<vmem>>, %arg6: memref<128x512xbf16, #tpu.memory_space<vmem>>, %arg7: memref<1x512xf32, #tpu.memory_space<vmem>>, %arg8: memref<512x128xbf16, #tpu.memory_space<vmem>>, %arg9: memref<1x128xf32, #tpu.memory_space<vmem>>, %arg10: memref<16x128xbf16, #tpu.memory_space<vmem>>) attributes {dimension_semantics = [#tpu.dimension_semantics<parallel>], iteration_bounds = array<i64: 1>, scalar_prefetch = 0 : i64, scratch_operands = 0 : i64, tpu.core_type = #tpu.core_type<tc>, window_params = [{transform_indices = @transform_0, window_bounds = array<i64: 16, 8>}, {transform_indices = @transform_1, window_bounds = array<i64: 16, 8>}, {pipeline_mode = #tpu.pipeline_mode<synchronous>, transform_indices = @transform_2, window_bounds = array<i64: 128, 128>}, {pipeline_mode = #tpu.pipeline_mode<synchronous>, transform_indices = @transform_3, window_bounds = array<i64: 128, 128>}, {pipeline_mode = #tpu.pipeline_mode<synchronous>, transform_indices = @transform_4, window_bounds = array<i64: 1, 128>}, {pipeline_mode = #tpu.pipeline_mode<synchronous>, transform_indices = @transform_5, window_bounds = array<i64: 128, 512>}, {pipeline_mode = #tpu.pipeline_mode<synchronous>, transform_indices = @transform_6, window_bounds = array<i64: 1, 512>}, {pipeline_mode = #tpu.pipeline_mode<synchronous>, transform_indices = @transform_7, window_bounds = array<i64: 512, 128>}, {pipeline_mode = #tpu.pipeline_mode<synchronous>, transform_indices = @transform_8, window_bounds = array<i64: 1, 128>}, {transform_indices = @transform_9, window_bounds = array<i64: 16, 128>}]} {
    %c0 = arith.constant 0 : index
    %c0_0 = arith.constant 0 : index
    %0 = vector.load %arg1[%c0, %c0_0] : memref<16x8xi32, #tpu.memory_space<vmem>>, vector<16x8xi32>
    %c0_1 = arith.constant 0 : index
    %c0_2 = arith.constant 0 : index
    %1 = vector.load %arg2[%c0_1, %c0_2] : memref<16x8xi32, #tpu.memory_space<vmem>>, vector<16x8xi32>
    %2 = arith.sitofp %1 : vector<16x8xi32> to vector<16x8xf32>
    %cst = arith.constant dense<0.000000e+00> : vector<16xf32>
    %3 = vector.multi_reduction <add>, %2, %cst [1] : vector<16x8xf32> to vector<16xf32>
    %4 = vector.shape_cast %3 : vector<16xf32> to vector<16x1xf32>
    %cst_3 = arith.constant 1.000000e+00 : f32
    %5 = vector.broadcast %cst_3 : f32 to vector<16x1xf32>
    %6 = arith.maximumf %4, %5 : vector<16x1xf32>
    %7 = tpu.reciprocal %6 {approx = true} : vector<16x1xf32> -> vector<16x1xf32>
    %8 = vector.broadcast %7 : vector<16x1xf32> to vector<16x8xf32>
    %9 = arith.mulf %2, %8 : vector<16x8xf32>
    %10 = tpu.iota {dimensions = array<i32: 2>} : vector<16x8x128xi32>
    %11 = vector.shape_cast %0 : vector<16x8xi32> to vector<16x8x1xi32>
    %12 = vector.broadcast %11 : vector<16x8x1xi32> to vector<16x8x128xi32>
    %13 = arith.cmpi eq, %12, %10 : vector<16x8x128xi32>
    %14 = vector.shape_cast %9 : vector<16x8xf32> to vector<16x8x1xf32>
    %cst_4 = arith.constant 0.000000e+00 : f32
    %15 = vector.shape_cast %14 : vector<16x8x1xf32> to vector<16x8x1xf32>
    %16 = vector.broadcast %15 : vector<16x8x1xf32> to vector<16x8x128xf32>
    %17 = vector.broadcast %cst_4 : f32 to vector<16x8x128xf32>
    %18 = arith.select %13, %16, %17 : vector<16x8x128xi1>, vector<16x8x128xf32>
    %cst_5 = arith.constant dense<0.000000e+00> : vector<16x128xf32>
    %19 = vector.multi_reduction <add>, %18, %cst_5 [1] : vector<16x8x128xf32> to vector<16x128xf32>
    %c0_6 = arith.constant 0 : index
    %c0_7 = arith.constant 0 : index
    %20 = vector.load %arg3[%c0_6, %c0_7] : memref<128x128xf32, #tpu.memory_space<vmem>>, vector<128x128xf32>
    %cst_8 = arith.constant dense<0.000000e+00> : vector<16x128xf32>
    %21 = tpu.matmul %19, %20, %cst_8 {dimension_numbers = #tpu.dot_dimension_numbers<[1], [0], [0], [1], [0, 0, 1, 1], [], []>} : vector<16x128xf32>, vector<128x128xf32>, vector<16x128xf32> -> vector<16x128xf32>
    %22 = arith.truncf %21 : vector<16x128xf32> to vector<16x128xbf16>
    %c0_9 = arith.constant 0 : index
    %c0_10 = arith.constant 0 : index
    %23 = vector.load %arg4[%c0_9, %c0_10] : memref<128x128xbf16, #tpu.memory_space<vmem>>, vector<128x128xbf16>
    %cst_11 = arith.constant dense<0.000000e+00> : vector<16x128xf32>
    %24 = tpu.matmul %22, %23, %cst_11 {dimension_numbers = #tpu.dot_dimension_numbers<[1], [0], [0], [1], [0, 0, 1, 1], [], []>} : vector<16x128xbf16>, vector<128x128xbf16>, vector<16x128xf32> -> vector<16x128xf32>
    %c0_12 = arith.constant 0 : index
    %c0_13 = arith.constant 0 : index
    %25 = vector.load %arg5[%c0_12, %c0_13] : memref<1x128xf32, #tpu.memory_space<vmem>>, vector<1x128xf32>
    %26 = vector.broadcast %25 : vector<1x128xf32> to vector<16x128xf32>
    %27 = arith.addf %24, %26 : vector<16x128xf32>
    %28 = math.tanh %27 : vector<16x128xf32>
    %29 = arith.truncf %28 : vector<16x128xf32> to vector<16x128xbf16>
    %c0_14 = arith.constant 0 : index
    %c0_15 = arith.constant 0 : index
    %30 = vector.load %arg6[%c0_14, %c0_15] : memref<128x512xbf16, #tpu.memory_space<vmem>>, vector<128x512xbf16>
    %cst_16 = arith.constant dense<0.000000e+00> : vector<16x512xf32>
    %31 = tpu.matmul %29, %30, %cst_16 {dimension_numbers = #tpu.dot_dimension_numbers<[1], [0], [0], [1], [0, 0, 1, 1], [], []>} : vector<16x128xbf16>, vector<128x512xbf16>, vector<16x512xf32> -> vector<16x512xf32>
    %c0_17 = arith.constant 0 : index
    %c0_18 = arith.constant 0 : index
    %32 = vector.load %arg7[%c0_17, %c0_18] : memref<1x512xf32, #tpu.memory_space<vmem>>, vector<1x512xf32>
    %33 = vector.broadcast %32 : vector<1x512xf32> to vector<16x512xf32>
    %34 = arith.addf %31, %33 : vector<16x512xf32>
    %cst_19 = arith.constant 5.000000e-01 : f32
    %35 = vector.broadcast %cst_19 : f32 to vector<16x512xf32>
    %36 = arith.mulf %35, %34 : vector<16x512xf32>
    %cst_20 = arith.constant 4.471500e-02 : f32
    %37 = vector.broadcast %cst_20 : f32 to vector<16x512xf32>
    %38 = arith.mulf %37, %34 : vector<16x512xf32>
    %39 = arith.mulf %38, %34 : vector<16x512xf32>
    %40 = arith.mulf %39, %34 : vector<16x512xf32>
    %41 = arith.addf %34, %40 : vector<16x512xf32>
    %cst_21 = arith.constant 0.797884583 : f32
    %42 = vector.broadcast %cst_21 : f32 to vector<16x512xf32>
    %43 = arith.mulf %42, %41 : vector<16x512xf32>
    %44 = math.tanh %43 : vector<16x512xf32>
    %cst_22 = arith.constant 1.000000e+00 : f32
    %45 = vector.broadcast %cst_22 : f32 to vector<16x512xf32>
    %46 = arith.addf %45, %44 : vector<16x512xf32>
    %47 = arith.mulf %36, %46 : vector<16x512xf32>
    %48 = arith.truncf %47 : vector<16x512xf32> to vector<16x512xbf16>
    %c0_23 = arith.constant 0 : index
    %c0_24 = arith.constant 0 : index
    %49 = vector.load %arg8[%c0_23, %c0_24] : memref<512x128xbf16, #tpu.memory_space<vmem>>, vector<512x128xbf16>
    %cst_25 = arith.constant dense<0.000000e+00> : vector<16x128xf32>
    %50 = tpu.matmul %48, %49, %cst_25 {dimension_numbers = #tpu.dot_dimension_numbers<[1], [0], [0], [1], [0, 0, 1, 1], [], []>} : vector<16x512xbf16>, vector<512x128xbf16>, vector<16x128xf32> -> vector<16x128xf32>
    %c0_26 = arith.constant 0 : index
    %c0_27 = arith.constant 0 : index
    %51 = vector.load %arg9[%c0_26, %c0_27] : memref<1x128xf32, #tpu.memory_space<vmem>>, vector<1x128xf32>
    %52 = vector.broadcast %51 : vector<1x128xf32> to vector<16x128xf32>
    %53 = arith.addf %50, %52 : vector<16x128xf32>
    %54 = arith.truncf %53 : vector<16x128xf32> to vector<16x128xbf16>
    %c0_28 = arith.constant 0 : index
    %c0_29 = arith.constant 0 : index
    %55 = vector.load %arg10[%c0_28, %c0_29] : memref<16x128xbf16, #tpu.memory_space<vmem>>, vector<16x128xbf16>
    tpu.vector_store %arg10[%c0_28, %c0_29], %54 {strides = array<i32>} : memref<16x128xbf16, #tpu.memory_space<vmem>>, vector<16x128xbf16>,
    return
  }
  func.func @transform_0(%arg0: i32) -> (i32, i32) {
    %c0_i32 = arith.constant 0 : i32
    %c0_i32_0 = arith.constant 0 : i32
    return %arg0, %c0_i32 : i32, i32
  }
  func.func @transform_1(%arg0: i32) -> (i32, i32) {
    %c0_i32 = arith.constant 0 : i32
    %c0_i32_0 = arith.constant 0 : i32
    return %arg0, %c0_i32 : i32, i32
  }
  func.func @transform_2(%arg0: i32) -> (i32, i32) {
    %c0_i32 = arith.constant 0 : i32
    %c0_i32_0 = arith.constant 0 : i32
    %c0_i32_1 = arith.constant 0 : i32
    return %c0_i32, %c0_i32_0 : i32, i32
  }
  func.func @transform_3(%arg0: i32) -> (i32, i32) {
    %c0_i32 = arith.constant 0 : i32
    %c0_i32_0 = arith.constant 0 : i32
    %c0_i32_1 = arith.constant 0 : i32
    return %c0_i32, %c0_i32_0 : i32, i32
  }
  func.func @transform_4(%arg0: i32) -> (i32, i32) {
    %c0_i32 = arith.constant 0 : i32
    %c0_i32_0 = arith.constant 0 : i32
    %c0_i32_1 = arith.constant 0 : i32
    return %c0_i32, %c0_i32_0 : i32, i32
  }
  func.func @transform_5(%arg0: i32) -> (i32, i32) {
    %c0_i32 = arith.constant 0 : i32
    %c0_i32_0 = arith.constant 0 : i32
    %c0_i32_1 = arith.constant 0 : i32
    return %c0_i32, %c0_i32_0 : i32, i32
  }
  func.func @transform_6(%arg0: i32) -> (i32, i32) {
    %c0_i32 = arith.constant 0 : i32
    %c0_i32_0 = arith.constant 0 : i32
    %c0_i32_1 = arith.constant 0 : i32
    return %c0_i32, %c0_i32_0 : i32, i32
  }
  func.func @transform_7(%arg0: i32) -> (i32, i32) {
    %c0_i32 = arith.constant 0 : i32
    %c0_i32_0 = arith.constant 0 : i32
    %c0_i32_1 = arith.constant 0 : i32
    return %c0_i32, %c0_i32_0 : i32, i32
  }
  func.func @transform_8(%arg0: i32) -> (i32, i32) {
    %c0_i32 = arith.constant 0 : i32
    %c0_i32_0 = arith.constant 0 : i32
    %c0_i32_1 = arith.constant 0 : i32
    return %c0_i32, %c0_i32_0 : i32, i32
  }
  func.func @transform_9(%arg0: i32) -> (i32, i32) {
    %c0_i32 = arith.constant 0 : i32
    %c0_i32_0 = arith.constant 0 : i32
    return %arg0, %c0_i32 : i32, i32
  }
}

</mosaic_0001>

<bundles_post_ra>
// kernel: mm_regressor_forward.1
= control target key start
LH: loop header
LB: loop body
LE: loop exit
PB: predicated region body
PF: predicated region fallthrough
CT: control target
= control target key end

     0   :  { %14 = vsyncpa [#allocation3], 0  ;;  %s2010_s0 = inlined_call_operand.vmem [shape: s32[16,8], index: 0, kind: input, shape index: {}]   ;;  %s2011_s1 = inlined_call_operand.vmem [shape: s32[16,8], index: 1, kind: input, shape index: {}]   ;;  %s2012_s2 = inlined_call_operand.hbm [shape: f32[128,128], index: 2, kind: input, shape index: {}]   ;;  %s2013_s3 = inlined_call_operand.hbm [shape: bf16[128,128], index: 3, kind: input, shape index: {}]   ;;  %s2014_s4 = inlined_call_operand.vmem [shape: f32[1,128], index: 4, kind: input, shape index: {}]   ;;  %s2015_s5 = inlined_call_operand.hbm [shape: bf16[128,512], index: 5, kind: input, shape index: {}]   ;;  %s2016_s6 = inlined_call_operand.vmem [shape: f32[1,512], index: 6, kind: input, shape index: {}]   ;;  %s2017_s7 = inlined_call_operand.hbm [shape: bf16[512,128], index: 7, kind: input, shape index: {}]   ;;  %s2018_s8 = inlined_call_operand.vmem [shape: f32[1,128], index: 8, kind: input, shape index: {}]   ;;  %s2019_s9 = inlined_call_operand.vmem [shape: bf16[16,128], index: 9, kind: output, shape index: {}]  }
   0x1   :  { %15 = vsyncpa [#allocation5], 0  ;;  %s38_s11 = sshll.u32 %s2013_s3, 4  ;;  %s39_s11 = int_to_ptr.hbm [resolvable:$true] %s38_s11 }
   0x2   :  { %16 = vsyncpa [#allocation8], 0  ;;  %s1799_s12 = smov [#allocation4]   ;;  %s25_s16 = sshll.u32 %s2012_s2, 4  ;;  %s26_s16 = int_to_ptr.hbm [resolvable:$true] %s25_s16 }
   0x3   :  { %s40_s13 = sshll.u32 %s1799_s12, 4  ;;  %s1800_s17 = smov 64   ;;  %s41_s13 = int_to_ptr.vmem [resolvable:$true] %s40_s13 }
   0x4   :  { %s1801_s18 = smov 4   ;;  %s1802_s19 = smov [#allocation2]  }
   0x5   :  { %46 = dma.hbm_to_vmem [thread:$0]  %s39_s11, 1024, %s41_s13, [#allocation5], %s1800_s17, %s1800_s17, %s1801_s18  }
   0x6   :  { %s27_s20 = sshll.u32 %s1802_s19, 4  ;;  %s1803_s21 = smov 128   ;;  %s28_s20 = int_to_ptr.vmem [resolvable:$true] %s27_s20 }
   0x7   :  { %s1804_s22 = smov 8   ;;  %s53_s24 = sshll.u32 %s2015_s5, 4  ;;  %s54_s24 = int_to_ptr.hbm [resolvable:$true] %s53_s24 }
   0x8   :  { %33 = dma.hbm_to_vmem [thread:$0]  %s26_s16, 2048, %s28_s20, [#allocation3], %s1803_s21, %s1803_s21, %s1804_s22  }
   0x9   :  { %s1805_s25 = smov [#allocation6]   ;;  %s68_s28 = sshll.u32 %s2017_s7, 4  ;;  %s69_s28 = int_to_ptr.hbm [resolvable:$true] %s68_s28 }
   0xa   :  { %s55_s26 = sshll.u32 %s1805_s25, 4  ;;  %s1806_s29 = smov 256   ;;  %s56_s26 = int_to_ptr.vmem [resolvable:$true] %s55_s26 }
   0xb   :  { %s1807_s30 = smov 16   ;;  %s1808_s10 = smov [#allocation7]  }
   0xc   :  { %61 = dma.hbm_to_vmem [thread:$0]  %s54_s24, 4096, %s56_s26, [#allocation5], %s1806_s29, %s1806_s29, %s1807_s30  }
   0xd   :  { %s70_s11 = sshll.u32 %s1808_s10, 4  ;;  %s71_s11 = int_to_ptr.vmem [resolvable:$true] %s70_s11 }
   0xe   :  { %76 = dma.hbm_to_vmem [thread:$0]  %s69_s28, 4096, %s71_s11, [#allocation8], %s1800_s17, %s1800_s17, %s1801_s18  }
   0xf   :  { %1793 = dma.done.wait [#allocation3], 2048  }
  0x10   :  { %1794 = vsyncadd [#allocation3], 4294965248 }
  0x11   :  { %1795 = dma.done.wait [#allocation5], 5120  }
  0x12   :  { %1796 = vsyncadd [#allocation5], 4294962176 }
  0x13   :  { %1797 = dma.done.wait [#allocation8], 4096  }
  0x14   :  { %1798 = vsyncadd [#allocation8], 4294963200  ;;  %v114_v0 = vlaneseq  ;;  %v97_v2 = vld [vmem:[%s2011_s1] sm:$0xff]  ;;  %vm101_vm0 = vcmask 64512   ;;  %v98_v6 = vld [vmem:[%s2011_s1 + $0x8] sm:$0xff]  ;;  %vm500_vm11 = vcmask 1041409  }
  0x15   :  { %v95_v3 = vld [vmem:[%s2010_s0] sm:$0xff]  ;;  %v99_v4 = vcvt.s32.f32 %v97_v2  ;;  %v100_v8 = vcvt.s32.f32 %v98_v6  ;;  %v1883_v14 = vld [vmem:[%s2010_s0 + $0x8] sm:$0xff]  ;;  %v483_v59 = vld [vmem:[#allocation2 + $0x78] sm:$0xff]  ;;  %vm502_vm12 = vcmask 1042434   ;;  %vm504_vm13 = vcmask 1043459  }
  0x16   :  { %v118_v1 = vshrl.u32 %v114_v0, 7  ;;  %v116_v5 = vperm.slane %v95_v3, 0  ;;  %v123_v10 = vperm.slane %v95_v3, 1  ;;  %v137_v11 = vperm.slane %v95_v3, 3  ;;  %523 = vmatpush.msra.mxu0 %v483_v59  ;;  %v482_v62 = vld [vmem:[#allocation2 + $0x70] sm:$0xff]  ;;  %v481_v63 = vld [vmem:[#allocation2 + $0x68] sm:$0xff] }
  0x17   :  { %v102_v7 = vsel %vm101_vm0, %v99_v4, 0.0  ;;  %v105_v9 = vsel %vm101_vm0, %v100_v8, 0.0  ;;  %v144_v12 = vperm.slane %v95_v3, 4  ;;  %v151_v13 = vperm.slane %v95_v3, 5  ;;  %v479_v2 = vld [vmem:[#allocation2 + $0x58] sm:$0xff]  ;;  %v477_v6 = vld [vmem:[#allocation2 + $0x48] sm:$0xff] }
  0x18   :  { %1668 = vset.pattern.permute.xlu1 %v118_v1  ;;  %1669 = vset.pattern.permute.xlu2 %v118_v1  ;;  %v130_v15 = vperm.slane %v95_v3, 2  ;;  %v186_v16 = vperm.slane %v1883_v14, 2  ;;  %v158_v17 = vperm.slane %v95_v3, 6  ;;  %v179_v18 = vperm.slane %v1883_v14, 1 }
  0x19   :  { %1670 = vset.pattern.permute.xlu0 %v118_v1  ;;  %v193_v19 = vperm.slane %v1883_v14, 3  ;;  %v165_v20 = vperm.slane %v95_v3, 7  ;;  %v200_v21 = vperm.slane %v1883_v14, 4  ;;  %v172_v22 = vperm.slane %v1883_v14, 0  ;;  %524 = vmatpush.msra.mxu0 %v482_v62 }
  0x1a   :  { %103 = vadd.xlane.f32.xlu0 %v102_v7  ;;  %v207_v23 = vperm.slane %v1883_v14, 5  ;;  %v214_v24 = vperm.slane %v1883_v14, 6  ;;  %v1892_v25 = vand.u32 127, %v114_v0  ;;  %v221_v56 = vperm.slane %v1883_v14, 7  ;;  %v480_v0 = vld [vmem:[#allocation2 + $0x60] sm:$0xff] }
  0x1b   :  { %525 = vmatpush.msra.mxu0 %v481_v63  ;;  %vm506_vm14 = vcmask 1044484  }
  0x1d   :  { %526 = vmatpush.msra.mxu0 %v480_v0 }
  0x1f   :  { %527 = vmatpush.msra.mxu0 %v479_v2 }
  0x20   :  { %121 = vperm.xlu1 %1668, %v116_v5   ;;  %135 = vperm.xlu2 %1669, %v130_v15   ;;  %v478_v5 = vld [vmem:[#allocation2 + $0x50] sm:$0xff]  ;;  %v473_v15 = vld [vmem:[#allocation2 + $0x28] sm:$0xff] }
  0x21   :  { %528 = vmatpush.msra.mxu0 %v478_v5 }
  0x22   :  { %106 = vadd.xlane.f32.xlu0 %v105_v9  ;;  %v475_v9 = vld [vmem:[#allocation2 + $0x38] sm:$0xff] }
  0x23   :  { %529 = vmatpush.msra.mxu0 %v477_v6 }
  0x28   :  { %128 = vperm.xlu1 %1668, %v123_v10   ;;  %184 = vperm.xlu2 %1669, %v179_v18  }
  0x30   :  { %142 = vperm.xlu1 %1668, %v137_v11   ;;  %205 = vperm.xlu2 %1669, %v200_v21   ;;  %v474_v11 = vld [vmem:[#allocation2 + $0x30] sm:$0xff] }
  0x36   :  { %191 = vperm.xlu0 %1670, %v186_v16  }
  0x38   :  { %149 = vperm.xlu1 %1668, %v144_v12  }
  0x3e   :  { %198 = vperm.xlu0 %1670, %v193_v19  }
  0x40   :  { %156 = vperm.xlu1 %1668, %v151_v13  }
  0x46   :  { %219 = vperm.xlu0 %1670, %v214_v24  }
  0x48   :  { %163 = vperm.xlu1 %1668, %v158_v17  }
  0x50   :  { %170 = vperm.xlu1 %1668, %v165_v20   ;;  %v472_v20 = vld [vmem:[#allocation2 + $0x20] sm:$0xff] }
  0x58   :  { %177 = vperm.xlu1 %1668, %v172_v22   ;;  %v471_v22 = vld [vmem:[#allocation2 + $0x18] sm:$0xff] }
  0x60   :  { %212 = vperm.xlu1 %1668, %v207_v23  }
  0x7a   :  { %v136_v43 = vpop.permute.xlu2 %135 }
  0x7b   :  { %vm230_vm4 = vcmp.eq.s32.totalorder %v136_v43, %v1892_v25 }
  0x82   :  { %v1898_v47 = vpop.permute.xlu2 %184 }
  0x83   :  { %vm237_vm2 = vcmp.eq.s32.totalorder %v1898_v47, %v1892_v25 }
  0x8a   :  { %v1902_v50 = vpop.permute.xlu2 %205 }
  0x8b   :  { %vm240_vm3 = vcmp.eq.s32.totalorder %v1902_v50, %v1892_v25 }
  0x8d   :  { %v104_v26 = vpop.xlane.xlu0 %103 }
  0x8e   :  { %v108_v28 = vmax.f32 %v104_v26, 1.0  ;;  %v470_v26 = vld [vmem:[#allocation2 + $0x10] sm:$0xff] }
  0x90   :  { %1673 = vrcp.f32 %v108_v28  ;;  %v469_v28 = vld [vmem:[#allocation2 + $0x8] sm:$0xff] }
  0x92   :  { %v1894_v27 = vpop.permute.xlu1 %121 }
  0x93   :  { %vm228_vm1 = vcmp.eq.s32.totalorder %v1894_v27, %v1892_v25 }
  0x95   :  { %v107_v29 = vpop.xlane.xlu0 %106 }
  0x96   :  { %v1674_v30 = vpop.eup %1673  ;;  %v109_v31 = vmax.f32 %v107_v29, 1.0 }
  0x97   :  { %v112_v32 = vmul.f32 %v1674_v30, %v99_v4 }
  0x98   :  { %1675 = vrcp.f32 %v109_v31 }
  0x99   :  { %v251_v33 = vperm.slane %v112_v32, 1  ;;  %v244_v34 = vperm.slane %v112_v32, 0  ;;  %v293_v37 = vperm.slane %v112_v32, 7  ;;  %v258_v38 = vperm.slane %v112_v32, 2 }
  0x9a   :  { %v265_v42 = vperm.slane %v112_v32, 3  ;;  %v272_v45 = vperm.slane %v112_v32, 4  ;;  %v279_v48 = vperm.slane %v112_v32, 5  ;;  %v286_v51 = vperm.slane %v112_v32, 6  ;;  %v1906_v52 = vpop.permute.xlu1 %128 }
  0x9b   :  { %256 = vperm.xlu0 %1670, %v251_v33   ;;  %249 = vperm.xlu2 %1669, %v244_v34   ;;  %vm229_vm6 = vcmp.eq.s32.totalorder %v1906_v52, %v1892_v25 }
  0x9e   :  { %v1676_v35 = vpop.eup %1675 }
  0x9f   :  { %v113_v36 = vmul.f32 %v1676_v35, %v100_v8  ;;  %v476_v8 = vld [vmem:[#allocation2 + $0x40] sm:$0xff] }
  0xa0   :  { %530 = vmatpush.msra.mxu0 %v476_v8 }
  0xa1   :  { %v300_v39 = vperm.slane %v113_v36, 0  ;;  %v321_v40 = vperm.slane %v113_v36, 3  ;;  %v314_v41 = vperm.slane %v113_v36, 2  ;;  %v342_v44 = vperm.slane %v113_v36, 6 }
  0xa2   :  { %v335_v46 = vperm.slane %v113_v36, 5  ;;  %v349_v49 = vperm.slane %v113_v36, 7  ;;  %v307_v53 = vperm.slane %v113_v36, 1  ;;  %v328_v54 = vperm.slane %v113_v36, 4  ;;  %v143_v55 = vpop.permute.xlu1 %142  ;;  %531 = vmatpush.msra.mxu0 %v475_v9  ;;  %v468_v36 = vld [vmem:[#allocation2] sm:$0xff] }
  0xa3   :  { %298 = vperm.xlu0 %1670, %v293_v37   ;;  %263 = vperm.xlu2 %1669, %v258_v38   ;;  %vm231_vm5 = vcmp.eq.s32.totalorder %v143_v55, %v1892_v25 }
  0xa4   :  { %305 = vperm.xlu1 %1668, %v300_v39   ;;  %532 = vmatpush.msra.mxu0 %v474_v11 }
  0xa6   :  { %533 = vmatpush.msra.mxu0 %v473_v15 }
  0xa8   :  { %v1911_v60 = vpop.permute.xlu0 %191  ;;  %534 = vmatpush.msra.mxu0 %v472_v20 }
  0xaa   :  { %v150_v57 = vpop.permute.xlu1 %149  ;;  %535 = vmatpush.msra.mxu0 %v471_v22 }
  0xab   :  { %326 = vperm.xlu0 %1670, %v321_v40   ;;  %270 = vperm.xlu2 %1669, %v265_v42   ;;  %vm232_vm7 = vcmp.eq.s32.totalorder %v150_v57, %v1892_v25 }
  0xac   :  { %319 = vperm.xlu1 %1668, %v314_v41   ;;  %536 = vmatpush.msra.mxu0 %v470_v26 }
  0xae   :  { %537 = vmatpush.msra.mxu0 %v469_v28 }
  0xb0   :  { %v1915_v3 = vpop.permute.xlu0 %198  ;;  %538 = vmatpush.msra.mxu0 %v468_v36 }
  0xb1   :  { %vm239_vm0 = vcmp.eq.s32.totalorder %v1915_v3, %v1892_v25 }
  0xb2   :  { %v1909_v58 = vpop.permute.xlu1 %156 }
  0xb3   :  { %347 = vperm.xlu0 %1670, %v342_v44   ;;  %277 = vperm.xlu2 %1669, %v272_v45   ;;  %vm233_vm8 = vcmp.eq.s32.totalorder %v1909_v58, %v1892_v25 }
  0xb4   :  { %340 = vperm.xlu1 %1668, %v335_v46  }
  0xb8   :  { %v1923_v13 = vpop.permute.xlu0 %219 }
  0xba   :  { %v1913_v61 = vpop.permute.xlu1 %163 }
  0xbb   :  { %284 = vperm.xlu2 %1669, %v279_v48   ;;  %vm234_vm15 = vcmp.eq.s32.totalorder %v1913_v61, %v1892_v25 }
  0xbc   :  { %354 = vperm.xlu1 %1668, %v349_v49  }
  0xc2   :  { %v1917_v4 = vpop.permute.xlu1 %170 }
  0xc3   :  { %291 = vperm.xlu2 %1669, %v286_v51   ;;  %vm235_vm9 = vcmp.eq.s32.totalorder %v1917_v4, %v1892_v25 }
  0xca   :  { %v1925_v14 = vpop.permute.xlu1 %177 }
  0xcb   :  { %312 = vperm.xlu2 %1669, %v307_v53   ;;  %vm236_vm10 = vcmp.eq.s32.totalorder %v1925_v14, %v1892_v25 }
  0xd2   :  { %v1931_v32 = vpop.permute.xlu1 %212 }
  0xd3   :  { %333 = vperm.xlu2 %1669, %v328_v54  }
  0xdb   :  { %226 = vperm.xlu2 %1669, %v221_v56  }
  0xf5   :  { %v250_v1 = vpop.permute.xlu2 %249 }
  0xf6   :  { %v356_v10 = vsel %vm228_vm1, %v250_v1, 0.0  ;;  %vm238_vm1 = vcmp.eq.s32.totalorder %v1911_v60, %v1892_v25 }
  0xf7   :  { %v372_v16 = vrot.slane %v356_v10, 4 }
  0xf9   :  { %v373_v23 = vadd.f32 %v372_v16, %v356_v10 }
  0xfb   :  { %v374_v29 = vrot.slane %v373_v23, 2 }
  0xfd   :  { %v264_v7 = vpop.permute.xlu2 %263  ;;  %v375_v40 = vadd.f32 %v374_v29, %v373_v23 }
  0xfe   :  { %v358_v12 = vsel %vm230_vm4, %v264_v7, 0.0  ;;  %vm508_vm4 = vcmask 1045509  }
  0xff   :  { %v384_v18 = vrot.slane %v358_v12, 4  ;;  %v376_v48 = vrot.slane %v375_v40, 1 }
 0x101   :  { %v385_v24 = vadd.f32 %v384_v18, %v358_v12  ;;  %v377_v1 = vadd.f32 %v376_v48, %v375_v40 }
 0x103   :  { %v386_v33 = vrot.slane %v385_v24, 2 }
 0x105   :  { %v271_v17 = vpop.permute.xlu2 %270  ;;  %v387_v43 = vadd.f32 %v386_v33, %v385_v24 }
 0x106   :  { %v359_v19 = vsel %vm231_vm5, %v271_v17, 0.0  ;;  %vm242_vm5 = vcmp.eq.s32.totalorder %v1923_v13, %v1892_v25 }
 0x107   :  { %v390_v21 = vrot.slane %v359_v19, 4  ;;  %v388_v54 = vrot.slane %v387_v43, 1 }
 0x109   :  { %v391_v27 = vadd.f32 %v390_v21, %v359_v19  ;;  %v389_v5 = vadd.f32 %v388_v54, %v387_v43 }
 0x10b   :  { %v392_v37 = vrot.slane %v391_v27, 2 }
 0x10d   :  { %v257_v30 = vpop.permute.xlu0 %256  ;;  %v278_v31 = vpop.permute.xlu2 %277  ;;  %v393_v44 = vadd.f32 %v392_v37, %v391_v27 }
 0x10e   :  { %v357_v34 = vsel %vm229_vm6, %v257_v30, 0.0  ;;  %v360_v35 = vsel %vm232_vm7, %v278_v31, 0.0  ;;  %vm241_vm6 = vcmp.eq.s32.totalorder %v1931_v32, %v1892_v25  ;;  %vm510_vm7 = vcmask 1046534  }
 0x10f   :  { %v378_v38 = vrot.slane %v357_v34, 4  ;;  %v396_v39 = vrot.slane %v360_v35, 4  ;;  %v394_v59 = vrot.slane %v393_v44, 1 }
 0x111   :  { %v379_v41 = vadd.f32 %v378_v38, %v357_v34  ;;  %v397_v42 = vadd.f32 %v396_v39, %v360_v35  ;;  %v395_v8 = vadd.f32 %v394_v59, %v393_v44  ;;  %v1588_v39 = vld [vmem:[#allocation4 + $0x38] sm:$0xff] }
 0x112   :  { %615 = vmatpush.bf16.msra.mxu1 %v1588_v39 }
 0x113   :  { %v380_v45 = vrot.slane %v379_v41, 2  ;;  %v398_v46 = vrot.slane %v397_v42, 2 }
 0x115   :  { %v381_v49 = vadd.f32 %v380_v45, %v379_v41  ;;  %v399_v51 = vadd.f32 %v398_v46, %v397_v42  ;;  %v299_v52 = vpop.permute.xlu0 %298  ;;  %v285_v53 = vpop.permute.xlu2 %284 }
 0x116   :  { %v363_v55 = vsel %vm235_vm9, %v299_v52, 0.0  ;;  %v361_v56 = vsel %vm233_vm8, %v285_v53, 0.0  ;;  %v306_v57 = vpop.permute.xlu1 %305  ;;  %vm512_vm8 = vcmask 1047559  }
 0x117   :  { %v382_v62 = vrot.slane %v381_v49, 1  ;;  %v414_v63 = vrot.slane %v363_v55, 4  ;;  %v402_v0 = vrot.slane %v361_v56, 4  ;;  %v400_v58 = vrot.slane %v399_v51, 1 }
 0x118   :  { %v364_v7 = vsel %vm236_vm10, %v306_v57, 0.0 }
 0x119   :  { %v383_v2 = vadd.f32 %v382_v62, %v381_v49  ;;  %v403_v4 = vadd.f32 %v402_v0, %v361_v56  ;;  %v415_v6 = vadd.f32 %v414_v63, %v363_v55  ;;  %v401_v11 = vadd.f32 %v400_v58, %v399_v51 }
 0x11a   :  { %v420_v15 = vrot.slane %v364_v7, 4 }
 0x11b   :  { %v501_v9 = vsel %vm500_vm11, %v383_v2, %v377_v1  ;;  %v404_v10 = vrot.slane %v403_v4, 2  ;;  %v416_v19 = vrot.slane %v415_v6, 2 }
 0x11c   :  { %v503_v12 = vsel %vm502_vm12, %v389_v5, %v501_v9  ;;  %v421_v31 = vadd.f32 %v420_v15, %v364_v7 }
 0x11d   :  { %v405_v14 = vadd.f32 %v404_v10, %v403_v4  ;;  %v327_v16 = vpop.permute.xlu0 %326  ;;  %v292_v17 = vpop.permute.xlu2 %291  ;;  %v505_v18 = vsel %vm504_vm13, %v395_v8, %v503_v12  ;;  %v417_v30 = vadd.f32 %v416_v19, %v415_v6 }
 0x11e   :  { %v367_v20 = vsel %vm239_vm0, %v327_v16, 0.0  ;;  %v362_v21 = vsel %vm234_vm15, %v292_v17, 0.0  ;;  %v320_v22 = vpop.permute.xlu1 %319  ;;  %v507_v23 = vsel %vm506_vm14, %v401_v11, %v505_v18  ;;  %v422_v41 = vrot.slane %v421_v31, 2 }
 0x11f   :  { %v406_v61 = vrot.slane %v405_v14, 1  ;;  %v408_v24 = vrot.slane %v362_v21, 4  ;;  %v438_v26 = vrot.slane %v367_v20, 4  ;;  %v366_v27 = vsel %vm238_vm1, %v320_v22, 0.0 }
 0x120   :  { %v432_v29 = vrot.slane %v366_v27, 4  ;;  %v418_v40 = vrot.slane %v417_v30, 1  ;;  %v423_v53 = vadd.f32 %v422_v41, %v421_v31  ;;  %v1586_v41 = vld [vmem:[#allocation4 + $0x28] sm:$0xff] }
 0x121   :  { %v407_v3 = vadd.f32 %v406_v61, %v405_v14  ;;  %v409_v28 = vadd.f32 %v408_v24, %v362_v21  ;;  %v439_v36 = vadd.f32 %v438_v26, %v367_v20 }
 0x122   :  { %v433_v34 = vadd.f32 %v432_v29, %v366_v27  ;;  %v419_v56 = vadd.f32 %v418_v40, %v417_v30  ;;  %v424_v1 = vrot.slane %v423_v53, 1  ;;  %v1587_v40 = vld [vmem:[#allocation4 + $0x30] sm:$0xff] }
 0x123   :  { %v410_v33 = vrot.slane %v409_v28, 2  ;;  %v509_v35 = vsel %vm508_vm4, %v407_v3, %v507_v23  ;;  %v440_v13 = vrot.slane %v439_v36, 2  ;;  %616 = vmatpush.bf16.msra.mxu1 %v1587_v40  ;;  %v1383_v40 = vld [vmem:[#allocation6 + $0x68] sm:$0xf] }
 0x124   :  { %v434_v46 = vrot.slane %v433_v34, 2  ;;  %v425_v12 = vadd.f32 %v424_v1, %v423_v53  ;;  %v1447_v53 = vld [vmem:[#allocation6 + $0xe8] sm:$0xf] }
 0x125   :  { %v411_v37 = vadd.f32 %v410_v33, %v409_v28  ;;  %v348_v60 = vpop.permute.xlu0 %347  ;;  %v313_v38 = vpop.permute.xlu2 %312  ;;  %v441_v62 = vadd.f32 %v440_v13, %v439_v36  ;;  %v1619_v13 = vld [vmem:[#allocation6 + $0xec] sm:$0xf0] }
 0x126   :  { %v370_v42 = vsel %vm242_vm5, %v348_v60, 0.0  ;;  %v365_v43 = vsel %vm237_vm2, %v313_v38, 0.0  ;;  %v341_v44 = vpop.permute.xlu1 %340  ;;  %v435_v47 = vadd.f32 %v434_v46, %v433_v34  ;;  %v1581_v46 = vld [vmem:[#allocation4] sm:$0xff] }
 0x127   :  { %v412_v45 = vrot.slane %v411_v37, 1  ;;  %v456_v48 = vrot.slane %v370_v42, 4  ;;  %v426_v49 = vrot.slane %v365_v43, 4  ;;  %v369_v51 = vsel %vm241_vm6, %v341_v44, 0.0  ;;  %617 = vmatpush.bf16.msra.mxu1 %v1586_v41  ;;  %v1583_v44 = vld [vmem:[#allocation4 + $0x10] sm:$0xff] }
 0x128   :  { %v450_v55 = vrot.slane %v369_v51, 4  ;;  %v436_v6 = vrot.slane %v435_v47, 1  ;;  %v442_v9 = vrot.slane %v441_v62, 1  ;;  %v1604_v41 = vld [vmem:[#allocation6 + $0x74] sm:$0xf0] }
 0x129   :  { %v413_v52 = vadd.f32 %v412_v45, %v411_v37  ;;  %v427_v54 = vadd.f32 %v426_v49, %v365_v43  ;;  %v457_v57 = vadd.f32 %v456_v48, %v370_v42  ;;  %v1585_v42 = vld [vmem:[#allocation4 + $0x20] sm:$0xff]  ;;  %v1584_v43 = vld [vmem:[#allocation4 + $0x18] sm:$0xff]  ;;  %v1582_v45 = vld [vmem:[#allocation4 + $0x8] sm:$0xff] }
 0x12a   :  { %v451_v63 = vadd.f32 %v450_v55, %v369_v51  ;;  %v437_v16 = vadd.f32 %v436_v6, %v435_v47  ;;  %v443_v19 = vadd.f32 %v442_v9, %v441_v62  ;;  %v1439_v48 = vld [vmem:[#allocation6 + $0xe0] sm:$0xf]  ;;  %v1617_v49 = vld [vmem:[#allocation6 + $0xe4] sm:$0xf]  ;;  %v1618_v47 = vld [vmem:[#allocation6 + $0xec] sm:$0xf] }
 0x12b   :  { %v511_v59 = vsel %vm510_vm7, %v413_v52, %v509_v35  ;;  %v428_v32 = vrot.slane %v427_v54, 2  ;;  %v458_v7 = vrot.slane %v457_v57, 2  ;;  %618 = vmatpush.bf16.msra.mxu1 %v1585_v42  ;;  %v1440_v51 = vor.u32 %v1619_v13, %v1439_v48  ;;  %v1441_v52 = vld [vmem:[#allocation6 + $0xf0] sm:$0xf0]  ;;  %v1611_v9 = vld [vmem:[#allocation6 + $0xac] sm:$0xf0] }
 0x12c   :  { %v513_v0 = vsel %vm512_vm8, %v419_v56, %v511_v59  ;;  %v452_v4 = vrot.slane %v451_v63, 2  ;;  %v1444_v55 = vor.u32 %v1617_v49, %v1441_v52  ;;  %v1423_v59 = vld [vmem:[#allocation6 + $0xc0] sm:$0xf]  ;;  %v1602_v42 = vld [vmem:[#allocation6 + $0x6c] sm:$0xf] }
 0x12d   :  { %v334_v58 = vpop.permute.xlu2 %333  ;;  %539 = vmatmul.f32.vlgmr.msra.gmra.mxu0 %v513_v0  ;;  %v429_v2 = vadd.f32 %v428_v32, %v427_v54  ;;  %v459_v17 = vadd.f32 %v458_v7, %v457_v57  ;;  %v1620_v54 = vld [vmem:[#allocation6 + $0xf4] sm:$0xf0]  ;;  %v1449_v57 = vld [vmem:[#allocation6 + $0xf8] sm:$0xf0]  ;;  %834 = vmatpush.bf16.msra.mxu2 %v1440_v51  ;;  %v1615_v32 = vld [vmem:[#allocation6 + $0xcc] sm:$0xf0] }
 0x12e   :  { %v368_v5 = vsel %vm240_vm3, %v334_v58, 0.0  ;;  %v453_v15 = vadd.f32 %v452_v4, %v451_v63  ;;  %v355_v61 = vpop.permute.xlu1 %354  ;;  %v1448_v56 = vor.u32 %v1620_v54, %v1447_v53  ;;  %v1452_v62 = vor.u32 %v1618_v47, %v1449_v57  ;;  %v1613_v63 = vld [vmem:[#allocation6 + $0xc4] sm:$0xf]  ;;  %v1425_v0 = vld [vmem:[#allocation6 + $0xd0] sm:$0xf0]  ;;  %848 = vmatpush.bf16.msra.mxu3 %v1444_v55 }
 0x12f   :  { %v444_v8 = vrot.slane %v368_v5, 4  ;;  %v430_v10 = vrot.slane %v429_v2, 1  ;;  %v460_v26 = vrot.slane %v459_v17, 1  ;;  %619 = vmatpush.bf16.msra.mxu1 %v1584_v43  ;;  %v1424_v58 = vor.u32 %v1615_v32, %v1423_v59  ;;  %v1616_v4 = vld [vmem:[#allocation6 + $0xd4] sm:$0xf0] }
 0x130   :  { %v454_v23 = vrot.slane %v453_v15, 1  ;;  %862 = vmatpush.bf16.msrb.mxu0 %v1448_v56  ;;  %v1428_v1 = vor.u32 %v1613_v63, %v1425_v0  ;;  %v1433_v7 = vld [vmem:[#allocation6 + $0xd8] sm:$0xf0]  ;;  %v1384_v43 = vor.u32 %v1604_v41, %v1383_v40  ;;  %v1599_v48 = vld [vmem:[#allocation6 + $0x4c] sm:$0xf0] }
 0x131   :  { %v445_v11 = vadd.f32 %v444_v8, %v368_v5  ;;  %v431_v14 = vadd.f32 %v430_v10, %v429_v2  ;;  %v461_v33 = vadd.f32 %v460_v26, %v459_v17  ;;  %v1431_v2 = vld [vmem:[#allocation6 + $0xc8] sm:$0xf]  ;;  %v1614_v5 = vld [vmem:[#allocation6 + $0xcc] sm:$0xf]  ;;  %v1407_v8 = vld [vmem:[#allocation6 + $0xa0] sm:$0xf]  ;;  %835 = vmatpush.bf16.msra.mxu2 %v1424_v58 }
 0x132   :  { %v455_v30 = vadd.f32 %v454_v23, %v453_v15  ;;  %v1432_v6 = vor.u32 %v1616_v4, %v1431_v2  ;;  %v1436_v10 = vor.u32 %v1614_v5, %v1433_v7  ;;  %v1408_v15 = vor.u32 %v1611_v9, %v1407_v8  ;;  %v1610_v17 = vld [vmem:[#allocation6 + $0xac] sm:$0xf]  ;;  %849 = vmatpush.bf16.msra.mxu3 %v1428_v1  ;;  %v1605_v26 = vld [vmem:[#allocation6 + $0x84] sm:$0xf]  ;;  %v1361_v51 = vld [vmem:[#allocation6 + $0x50] sm:$0xf0] }
 0x133   :  { %v446_v18 = vrot.slane %v445_v11, 2  ;;  %v514_v20 = vsel %vm500_vm11, %v431_v14, %v425_v12  ;;  %620 = vmatpush.bf16.msra.mxu1 %v1583_v44  ;;  %v1409_v12 = vld [vmem:[#allocation6 + $0xb0] sm:$0xf0]  ;;  %v1415_v14 = vld [vmem:[#allocation6 + $0xa8] sm:$0xf]  ;;  %v1640_v40 = vld [vmem:[#allocation7 + $0x98] sm:$0xff] }
 0x134   :  { %v515_v50 = vsel %vm502_vm12, %v437_v16, %v514_v20  ;;  %v1612_v16 = vld [vmem:[#allocation6 + $0xb4] sm:$0xf0]  ;;  %863 = vmatpush.bf16.msrb.mxu0 %v1432_v6  ;;  %v1385_v44 = vld [vmem:[#allocation6 + $0x78] sm:$0xf0]  ;;  %v1597_v13 = vld [vmem:[#allocation6 + $0x44] sm:$0xf] }
 0x135   :  { %v447_v21 = vadd.f32 %v446_v18, %v445_v11  ;;  %v227_v22 = vpop.permute.xlu2 %226  ;;  %v516_v24 = vsel %vm504_vm13, %v443_v19, %v515_v50  ;;  %v1609_v11 = vld [vmem:[#allocation6 + $0xa4] sm:$0xf]  ;;  %v1417_v18 = vld [vmem:[#allocation6 + $0xb8] sm:$0xf0]  ;;  %v1416_v20 = vor.u32 %v1612_v16, %v1415_v14  ;;  %836 = vmatpush.bf16.msra.mxu2 %v1408_v15  ;;  %v1367_v52 = vld [vmem:[#allocation6 + $0x48] sm:$0xf]  ;;  %v1364_v54 = vor.u32 %v1597_v13, %v1361_v51 }
 0x136   :  { %vm243_vm2 = vcmp.eq.s32.totalorder %v227_v22, %v1892_v25  ;;  %v1412_v19 = vor.u32 %v1609_v11, %v1409_v12  ;;  %v1600_v53 = vld [vmem:[#allocation6 + $0x54] sm:$0xf0]  ;;  %v1598_v56 = vld [vmem:[#allocation6 + $0x4c] sm:$0xf]  ;;  %v1369_v47 = vld [vmem:[#allocation6 + $0x58] sm:$0xf0] }
 0x137   :  { %v448_v27 = vrot.slane %v447_v21, 1  ;;  %v371_v3 = vsel %vm243_vm2, %v355_v61, 0.0  ;;  %621 = vmatpush.bf16.msra.mxu1 %v1582_v45  ;;  %v1391_v61 = vld [vmem:[#allocation6 + $0x80] sm:$0xf]  ;;  %v1388_v45 = vor.u32 %v1602_v42, %v1385_v44  ;;  %v1368_v55 = vor.u32 %v1600_v53, %v1367_v52  ;;  %v1593_v32 = vld [vmem:[#allocation6 + $0x24] sm:$0xf] }
 0x138   :  { %v462_v28 = vrot.slane %v371_v3, 4  ;;  %850 = vmatpush.bf16.msra.mxu3 %v1412_v19  ;;  %864 = vmatpush.bf16.msrb.mxu0 %v1416_v20  ;;  %v1343_v57 = vld [vmem:[#allocation6 + $0x20] sm:$0xf]  ;;  %v1372_v59 = vor.u32 %v1598_v56, %v1369_v47  ;;  %v1345_v63 = vld [vmem:[#allocation6 + $0x30] sm:$0xf0]  ;;  %v1648_v41 = vld [vmem:[#allocation7 + $0xd8] sm:$0xff] }
 0x139   :  { %v449_v29 = vadd.f32 %v448_v27, %v447_v21  ;;  %v1420_v21 = vor.u32 %v1610_v17, %v1417_v18  ;;  %v1348_v58 = vor.u32 %v1593_v32, %v1345_v63  ;;  %v1351_v1 = vld [vmem:[#allocation6 + $0x28] sm:$0xf]  ;;  %v1596_v2 = vld [vmem:[#allocation6 + $0x34] sm:$0xf0]  ;;  %v1594_v4 = vld [vmem:[#allocation6 + $0x2c] sm:$0xf] }
 0x13a   :  { %v463_v31 = vadd.f32 %v462_v28, %v371_v3  ;;  %v1393_v3 = vld [vmem:[#allocation6 + $0x90] sm:$0xf0]  ;;  %v1399_v28 = vld [vmem:[#allocation6 + $0x88] sm:$0xf]  ;;  %v1352_v5 = vor.u32 %v1596_v2, %v1351_v1  ;;  %v1353_v6 = vld [vmem:[#allocation6 + $0x38] sm:$0xf0] }
 0x13b   :  { %v517_v34 = vsel %vm506_vm14, %v449_v29, %v516_v24  ;;  %622 = vmatpush.bf16.msra.mxu1 %v1581_v46  ;;  %v1607_v24 = vld [vmem:[#allocation6 + $0x8c] sm:$0xf0]  ;;  %v1608_v29 = vld [vmem:[#allocation6 + $0x94] sm:$0xf0]  ;;  %v1359_v46 = vld [vmem:[#allocation6 + $0x40] sm:$0xf]  ;;  %v1356_v9 = vor.u32 %v1594_v4, %v1353_v6 }
 0x13c   :  { %v464_v35 = vrot.slane %v463_v31, 2  ;;  %v518_v36 = vsel %vm508_vm4, %v455_v30, %v517_v34  ;;  %v1392_v27 = vor.u32 %v1607_v24, %v1391_v61  ;;  %v1396_v30 = vor.u32 %v1605_v26, %v1393_v3  ;;  %v1401_v34 = vld [vmem:[#allocation6 + $0x98] sm:$0xf0]  ;;  %v1327_v7 = vld [vmem:[#allocation6] sm:$0xf]  ;;  %v1639_v44 = vld [vmem:[#allocation7 + $0x90] sm:$0xff] }
 0x13d   :  { %v519_v37 = vsel %vm510_vm7, %v461_v33, %v518_v36  ;;  %v1606_v33 = vld [vmem:[#allocation6 + $0x8c] sm:$0xf]  ;;  %v1360_v49 = vor.u32 %v1599_v48, %v1359_v46  ;;  %v1591_v8 = vld [vmem:[#allocation6 + $0xc] sm:$0xf0]  ;;  %v1329_v11 = vld [vmem:[#allocation6 + $0x10] sm:$0xf0] }
 0x13e   :  { %v465_v60 = vadd.f32 %v464_v35, %v463_v31  ;;  %v1400_v31 = vor.u32 %v1608_v29, %v1399_v28  ;;  %v1375_v35 = vld [vmem:[#allocation6 + $0x60] sm:$0xf]  ;;  %837 = vmatpush.bf16.msra.mxu2 %v1392_v27  ;;  %v1404_v36 = vor.u32 %v1606_v33, %v1401_v34  ;;  %851 = vmatpush.bf16.msra.mxu3 %v1396_v30  ;;  %v1335_v12 = vld [vmem:[#allocation6 + $0x8] sm:$0xf]  ;;  %v1592_v15 = vld [vmem:[#allocation6 + $0x14] sm:$0xf0] }
 0x13f   :  { %876 = vmatpush.bf16.msrb.mxu1 %v1452_v62  ;;  %v1595_v62 = vld [vmem:[#allocation6 + $0x2c] sm:$0xf0]  ;;  %v1328_v14 = vor.u32 %v1591_v8, %v1327_v7  ;;  %v1590_v16 = vld [vmem:[#allocation6 + $0xc] sm:$0xf]  ;;  %v1337_v17 = vld [vmem:[#allocation6 + $0x18] sm:$0xf0]  ;;  %v1336_v19 = vor.u32 %v1592_v15, %v1335_v12 }
 0x140   :  { %v466_v38 = vrot.slane %v465_v60, 1  ;;  %865 = vmatpush.bf16.msrb.mxu0 %v1400_v31  ;;  %v1344_v0 = vor.u32 %v1595_v62, %v1343_v57  ;;  %v1340_v20 = vor.u32 %v1590_v16, %v1337_v17  ;;  %v1644_v3 = vld [vmem:[#allocation7 + $0xb8] sm:$0xff]  ;;  %v1643_v29 = vld [vmem:[#allocation7 + $0xb0] sm:$0xff]  ;;  %v1642_v34 = vld [vmem:[#allocation7 + $0xa8] sm:$0xff] }
 0x141   :  { %v1652_v28 = vld [vmem:[#allocation7 + $0xf8] sm:$0xff]  ;;  %v1651_v30 = vld [vmem:[#allocation7 + $0xf0] sm:$0xff]  ;;  %v1625_v42 = vld [vmem:[#allocation7 + $0x20] sm:$0xff] }
 0x142   :  { %v467_v25 = vadd.f32 %v466_v38, %v465_v60  ;;  %v1601_v60 = vld [vmem:[#allocation6 + $0x64] sm:$0xf]  ;;  %v1377_v38 = vld [vmem:[#allocation6 + $0x70] sm:$0xf0]  ;;  %v1628_v31 = vld [vmem:[#allocation7 + $0x38] sm:$0xff] }
 0x143   :  { %877 = vmatpush.bf16.msrb.mxu1 %v1436_v10  ;;  %v1589_v10 = vld [vmem:[#allocation6 + $0x4] sm:$0xf]  ;;  %v1636_v33 = vld [vmem:[#allocation7 + $0x78] sm:$0xff]  ;;  %v1638_v13 = vld [vmem:[#allocation7 + $0x88] sm:$0xff] }
 0x144   :  { %v520_v39 = vsel %vm512_vm8, %v467_v25, %v519_v37  ;;  %v1603_v37 = vld [vmem:[#allocation6 + $0x6c] sm:$0xf0]  ;;  %866 = vmatpush.bf16.msrb.mxu0 %v1384_v43  ;;  %v1332_v18 = vor.u32 %v1589_v10, %v1329_v11  ;;  %v1633_v43 = vld [vmem:[#allocation7 + $0x60] sm:$0xff]  ;;  %v1624_v46 = vld [vmem:[#allocation7 + $0x18] sm:$0xff] }
 0x145   :  { %542 = vmatmul.f32.gmra.mxu0 %v520_v39  ;;  %v1376_v25 = vor.u32 %v1603_v37, %v1375_v35  ;;  %v1380_v39 = vor.u32 %v1601_v60, %v1377_v38  ;;  %v1650_v35 = vld [vmem:[#allocation7 + $0xe8] sm:$0xff]  ;;  %v1635_v37 = vld [vmem:[#allocation7 + $0x70] sm:$0xff]  ;;  %v1641_v60 = vld [vmem:[#allocation7 + $0xa0] sm:$0xff] }
 0x146   :  { %v1649_v38 = vld [vmem:[#allocation7 + $0xe0] sm:$0xff]  ;;  %v1632_v48 = vld [vmem:[#allocation7 + $0x58] sm:$0xff]  ;;  %v1623_v52 = vld [vmem:[#allocation7 + $0x10] sm:$0xff] }
 0x147   :  { %878 = vmatpush.bf16.msrb.mxu1 %v1420_v21  ;;  %838 = vmatpush.bf16.msra.mxu2 %v1376_v25  ;;  %v1626_v25 = vld [vmem:[#allocation7 + $0x28] sm:$0xff]  ;;  %v664_v51 = vld [vmem:[%s2016_s6] sm:$0xf]  ;;  %v1631_v53 = vld [vmem:[#allocation7 + $0x50] sm:$0xff] }
 0x148   :  { %852 = vmatpush.bf16.msra.mxu3 %v1380_v39  ;;  %867 = vmatpush.bf16.msrb.mxu0 %v1368_v55  ;;  %v1634_v39 = vld [vmem:[#allocation7 + $0x68] sm:$0xff]  ;;  %v669_v55 = vperm.slane %v664_v51, 3  ;;  %v1637_v56 = vld [vmem:[#allocation7 + $0x80] sm:$0xff]  ;;  %v667_v1 = vperm.slane %v664_v51, 1 }
 0x149   :  { %v1645_v47 = vld [vmem:[#allocation7 + $0xc0] sm:$0xff]  ;;  %v1622_v57 = vld [vmem:[#allocation7 + $0x8] sm:$0xff] }
 0x14a   :  { %v1629_v6 = vld [vmem:[#allocation7 + $0x40] sm:$0xff] }
 0x14b   :  { %879 = vmatpush.bf16.msrb.mxu1 %v1404_v36  ;;  %839 = vmatpush.bf16.msra.mxu2 %v1360_v49  ;;  %v1627_v36 = vld [vmem:[#allocation7 + $0x30] sm:$0xff]  ;;  %v1646_v49 = vld [vmem:[#allocation7 + $0xc8] sm:$0xff] }
 0x14c   :  { %853 = vmatpush.bf16.msra.mxu3 %v1364_v54  ;;  %868 = vmatpush.bf16.msrb.mxu0 %v1352_v5  ;;  %v668_v54 = vperm.slane %v664_v51, 2  ;;  %v1621_v5 = vld [vmem:[#allocation7] sm:$0xff] }
 0x14f   :  { %880 = vmatpush.bf16.msrb.mxu1 %v1388_v45  ;;  %840 = vmatpush.bf16.msra.mxu2 %v1344_v0  ;;  %v1647_v45 = vld [vmem:[#allocation7 + $0xd0] sm:$0xff] }
 0x150   :  { %854 = vmatpush.bf16.msra.mxu3 %v1348_v58  ;;  %869 = vmatpush.bf16.msrb.mxu0 %v1336_v19  ;;  %v666_v58 = vperm.slane %v664_v51, 0 }
 0x153   :  { %881 = vmatpush.bf16.msrb.mxu1 %v1372_v59  ;;  %841 = vmatpush.bf16.msra.mxu2 %v1328_v14  ;;  %v1630_v59 = vld [vmem:[#allocation7 + $0x48] sm:$0xff] }
 0x154   :  { %855 = vmatpush.bf16.msra.mxu3 %v1332_v18  ;;  %1254 = vmatpush.bf16.msra.mxu0 %v1644_v3 }
 0x157   :  { %882 = vmatpush.bf16.msrb.mxu1 %v1356_v9  ;;  %1226 = vmatpush.bf16.msrb.mxu2 %v1628_v31 }
 0x158   :  { %1255 = vmatpush.bf16.msra.mxu0 %v1643_v29  ;;  %1240 = vmatpush.bf16.msrb.mxu3 %v1636_v33 }
 0x15b   :  { %883 = vmatpush.bf16.msrb.mxu1 %v1340_v20  ;;  %1227 = vmatpush.bf16.msrb.mxu2 %v1627_v36 }
 0x15c   :  { %1256 = vmatpush.bf16.msra.mxu0 %v1642_v34  ;;  %1241 = vmatpush.bf16.msrb.mxu3 %v1635_v37 }
 0x15f   :  { %1228 = vmatpush.bf16.msrb.mxu2 %v1626_v25 }
 0x160   :  { %1257 = vmatpush.bf16.msra.mxu0 %v1641_v60  ;;  %1242 = vmatpush.bf16.msrb.mxu3 %v1634_v39 }
 0x163   :  { %1229 = vmatpush.bf16.msrb.mxu2 %v1625_v42 }
 0x164   :  { %1258 = vmatpush.bf16.msra.mxu0 %v1640_v40  ;;  %1243 = vmatpush.bf16.msrb.mxu3 %v1633_v43 }
 0x167   :  { %1230 = vmatpush.bf16.msrb.mxu2 %v1624_v46 }
 0x168   :  { %1259 = vmatpush.bf16.msra.mxu0 %v1639_v44  ;;  %1244 = vmatpush.bf16.msrb.mxu3 %v1632_v48 }
 0x16b   :  { %1231 = vmatpush.bf16.msrb.mxu2 %v1623_v52 }
 0x16c   :  { %1260 = vmatpush.bf16.msra.mxu0 %v1638_v13  ;;  %1245 = vmatpush.bf16.msrb.mxu3 %v1631_v53 }
 0x16f   :  { %1232 = vmatpush.bf16.msrb.mxu2 %v1622_v57 }
 0x170   :  { %1261 = vmatpush.bf16.msra.mxu0 %v1637_v56  ;;  %1246 = vmatpush.bf16.msrb.mxu3 %v1630_v59 }
 0x173   :  { %1233 = vmatpush.bf16.msrb.mxu2 %v1621_v5 }
 0x174   :  { %1247 = vmatpush.bf16.msrb.mxu3 %v1629_v6 }
 0x1aa   :  { %v540_v22 = vpop.f32.mrf.mxu0 }
 0x1c2   :  { %v543_v50 = vpop.f32.mrf.mxu0 }
 0x1c3   :  { %v546_v23 = vpack.c.bf16 %v543_v50, %v540_v22  ;;  %v1671_v22 = vld [vmem:[%s2014_s4] ss:$0 sm:$0xff] }
 0x1c5   :  { %623 = vmatmul.bf16.vlgmr.msra.gmra.mxu1 %v546_v23 }
 0x1c6   :  { %1268 = vmatpush.bf16.msra.mxu1 %v1652_v28 }
 0x1ca   :  { %1269 = vmatpush.bf16.msra.mxu1 %v1651_v30 }
 0x1ce   :  { %1270 = vmatpush.bf16.msra.mxu1 %v1650_v35 }
 0x1d2   :  { %1271 = vmatpush.bf16.msra.mxu1 %v1649_v38 }
 0x1d6   :  { %1272 = vmatpush.bf16.msra.mxu1 %v1648_v41 }
 0x1da   :  { %1273 = vmatpush.bf16.msra.mxu1 %v1647_v45 }
 0x1de   :  { %1274 = vmatpush.bf16.msra.mxu1 %v1646_v49 }
 0x1e2   :  { %1275 = vmatpush.bf16.msra.mxu1 %v1645_v47 }
 0x242   :  { %v624_v21 = vpop.f32.mrf.mxu1 }
 0x243   :  { %v625_v50 = vadd.f32 %v1671_v22, %v624_v21 }
 0x245   :  { %1677 = vtanh.f32 %v625_v50 }
 0x24a   :  { %v626_v23 = vpop.f32.mrf.mxu1 }
 0x24b   :  { %v627_v61 = vadd.f32 %v1671_v22, %v626_v23  ;;  %v1678_v24 = vpop.eup %1677 }
 0x24d   :  { %1679 = vtanh.f32 %v627_v61 }
 0x253   :  { %v1680_v26 = vpop.eup %1679 }
 0x254   :  { %v631_v27 = vpack.c.bf16 %v1680_v26, %v1678_v24 }
 0x256   :  { %842 = vmatmul.bf16.vlgmr.msra.gmra.mxu2 %v631_v27  ;;  %856 = vmatmul.bf16.vlgmr.msra.gmra.mxu3 %v631_v27 }
 0x257   :  { %870 = vmatmul.bf16.vlgmr.msrb.gmra.mxu0 %v631_v27  ;;  %884 = vmatmul.bf16.vlgmr.msrb.gmra.mxu1 %v631_v27 }
 0x2d4   :  { %v871_v62 = vpop.f32.mrf.mxu0  ;;  %v885_v32 = vpop.f32.mrf.mxu1 }
 0x2d5   :  { %v1976_v63 = vadd.f32 %v871_v62, %v668_v54  ;;  %v1978_v0 = vadd.f32 %v885_v32, %v669_v55 }
 0x2d7   :  { %v900_v2 = vmul.f32 0.044715, %v1976_v63  ;;  %v901_v4 = vmul.f32 0.044715, %v1978_v0  ;;  %v893_v6 = vmul.f32 0.5, %v1978_v0 }
 0x2d9   :  { %v908_v7 = vmul.f32 %v900_v2, %v1976_v63  ;;  %v909_v8 = vmul.f32 %v901_v4, %v1978_v0  ;;  %v843_v9 = vpop.f32.mrf.mxu2  ;;  %v857_v10 = vpop.f32.mrf.mxu3 }
 0x2da   :  { %v1984_v11 = vadd.f32 %v843_v9, %v666_v58  ;;  %v1986_v12 = vadd.f32 %v857_v10, %v667_v1 }
 0x2db   :  { %v916_v14 = vmul.f32 %v908_v7, %v1976_v63  ;;  %v917_v15 = vmul.f32 %v909_v8, %v1978_v0 }
 0x2dc   :  { %v898_v16 = vmul.f32 0.044715, %v1984_v11  ;;  %v899_v17 = vmul.f32 0.044715, %v1986_v12  ;;  %v873_v18 = vpop.f32.mrf.mxu0  ;;  %v887_v19 = vpop.f32.mrf.mxu1 }
 0x2dd   :  { %v924_v20 = vadd.f32 %v916_v14, %v1976_v63  ;;  %v874_v21 = vadd.f32 %v873_v18, %v668_v54  ;;  %v888_v22 = vadd.f32 %v887_v19, %v669_v55  ;;  %v925_v50 = vadd.f32 %v917_v15, %v1978_v0 }
 0x2de   :  { %v906_v23 = vmul.f32 %v898_v16, %v1984_v11  ;;  %v907_v61 = vmul.f32 %v899_v17, %v1986_v12 }
 0x2df   :  { %v904_v24 = vmul.f32 0.044715, %v874_v21  ;;  %v905_v26 = vmul.f32 0.044715, %v888_v22  ;;  %v932_v3 = vmul.f32 0.7978846, %v924_v20 }
 0x2e0   :  { %v914_v27 = vmul.f32 %v906_v23, %v1984_v11  ;;  %v915_v31 = vmul.f32 %v907_v61, %v1986_v12  ;;  %v933_v33 = vmul.f32 0.7978846, %v925_v50  ;;  %v896_v2 = vmul.f32 0.5, %v874_v21 }
 0x2e1   :  { %v912_v28 = vmul.f32 %v904_v24, %v874_v21  ;;  %v845_v29 = vpop.f32.mrf.mxu2  ;;  %v859_v30 = vpop.f32.mrf.mxu3  ;;  %v913_v34 = vmul.f32 %v905_v26, %v888_v22  ;;  %1681 = vtanh.f32 %v932_v3  ;;  %v897_v7 = vmul.f32 0.5, %v888_v22 }
 0x2e2   :  { %v846_v35 = vadd.f32 %v845_v29, %v666_v58  ;;  %v860_v36 = vadd.f32 %v859_v30, %v667_v1  ;;  %v922_v60 = vadd.f32 %v914_v27, %v1984_v11  ;;  %v923_v38 = vadd.f32 %v915_v31, %v1986_v12 }
 0x2e3   :  { %v920_v37 = vmul.f32 %v912_v28, %v874_v21  ;;  %v921_v25 = vmul.f32 %v913_v34, %v888_v22  ;;  %1683 = vtanh.f32 %v933_v33  ;;  %v892_v1 = vmul.f32 0.5, %v1976_v63 }
 0x2e4   :  { %v902_v39 = vmul.f32 0.044715, %v846_v35  ;;  %v903_v40 = vmul.f32 0.044715, %v860_v36  ;;  %v930_v42 = vmul.f32 0.7978846, %v922_v60 }
 0x2e5   :  { %v928_v41 = vadd.f32 %v920_v37, %v874_v21  ;;  %v929_v43 = vadd.f32 %v921_v25, %v888_v22  ;;  %v931_v48 = vmul.f32 0.7978846, %v923_v38  ;;  %v890_v23 = vmul.f32 0.5, %v1984_v11  ;;  %v1672_v11 = vld [vmem:[%s2018_s8] ss:$0 sm:$0xff] }
 0x2e6   :  { %v910_v44 = vmul.f32 %v902_v39, %v846_v35  ;;  %v911_v45 = vmul.f32 %v903_v40, %v860_v36  ;;  %1685 = vtanh.f32 %v930_v42  ;;  %v894_v63 = vmul.f32 0.5, %v846_v35 }
 0x2e7   :  { %v936_v46 = vmul.f32 0.7978846, %v928_v41  ;;  %v937_v13 = vmul.f32 0.7978846, %v929_v43  ;;  %v1682_v54 = vpop.eup %1681  ;;  %v891_v61 = vmul.f32 0.5, %v1986_v12  ;;  %v895_v0 = vmul.f32 0.5, %v860_v36 }
 0x2e8   :  { %v918_v49 = vmul.f32 %v910_v44, %v846_v35  ;;  %v919_v51 = vmul.f32 %v911_v45, %v860_v36  ;;  %v948_v59 = vadd.f32 1.0, %v1682_v54 }
 0x2e9   :  { %1687 = vtanh.f32 %v936_v46  ;;  %v1684_v55 = vpop.eup %1683 }
 0x2ea   :  { %1689 = vtanh.f32 %v937_v13  ;;  %v926_v52 = vadd.f32 %v918_v49, %v846_v35  ;;  %v927_v53 = vadd.f32 %v919_v51, %v860_v36  ;;  %v949_v32 = vadd.f32 1.0, %v1684_v55 }
 0x2eb   :  { %1691 = vtanh.f32 %v931_v48  ;;  %v956_v9 = vmul.f32 %v948_v59, %v892_v1 }
 0x2ec   :  { %v934_v56 = vmul.f32 0.7978846, %v926_v52  ;;  %v935_v47 = vmul.f32 0.7978846, %v927_v53  ;;  %v1686_v57 = vpop.eup %1685  ;;  %v957_v14 = vmul.f32 %v949_v32, %v893_v6 }
 0x2ed   :  { %v946_v16 = vadd.f32 1.0, %v1686_v57 }
 0x2ee   :  { %1693 = vtanh.f32 %v934_v56 }
 0x2ef   :  { %v1688_v62 = vpop.eup %1687  ;;  %1695 = vtanh.f32 %v935_v47  ;;  %v954_v24 = vmul.f32 %v946_v16, %v890_v23 }
 0x2f0   :  { %v1690_v58 = vpop.eup %1689  ;;  %v952_v4 = vadd.f32 1.0, %v1688_v62 }
 0x2f1   :  { %v1692_v5 = vpop.eup %1691  ;;  %v953_v8 = vadd.f32 1.0, %v1690_v58 }
 0x2f2   :  { %v960_v10 = vmul.f32 %v952_v4, %v896_v2  ;;  %v947_v19 = vadd.f32 1.0, %v1692_v5 }
 0x2f3   :  { %v961_v15 = vmul.f32 %v953_v8, %v897_v7 }
 0x2f4   :  { %v1694_v17 = vpop.eup %1693  ;;  %v964_v18 = vpack.c.bf16 %v960_v10, %v956_v9  ;;  %v955_v27 = vmul.f32 %v947_v19, %v891_v61 }
 0x2f5   :  { %v1696_v20 = vpop.eup %1695  ;;  %v965_v50 = vpack.c.bf16 %v961_v15, %v957_v14  ;;  %v950_v21 = vadd.f32 1.0, %v1694_v17 }
 0x2f6   :  { %1262 = vmatmul.bf16.vlgmr.msra.gmra.mxu0 %v964_v18  ;;  %v951_v22 = vadd.f32 1.0, %v1696_v20 }
 0x2f7   :  { %1276 = vmatmul.bf16.vlgmr.msra.gmra.mxu1 %v965_v50  ;;  %v958_v26 = vmul.f32 %v950_v21, %v894_v63 }
 0x2f8   :  { %v959_v3 = vmul.f32 %v951_v22, %v895_v0 }
 0x2f9   :  { %v962_v28 = vpack.c.bf16 %v958_v26, %v954_v24 }
 0x2fa   :  { %v963_v29 = vpack.c.bf16 %v959_v3, %v955_v27 }
 0x2fb   :  { %1234 = vmatmul.bf16.vlgmr.msrb.gmra.mxu2 %v962_v28 }
 0x2fc   :  { %1248 = vmatmul.bf16.vlgmr.msrb.gmra.mxu3 %v963_v29 }
 0x373   :  { %v1263_v33 = vpop.f32.mrf.mxu0 }
 0x374   :  { %v1277_v12 = vpop.f32.mrf.mxu1 }
 0x37b   :  { %v1265_v39 = vpop.f32.mrf.mxu0 }
 0x37c   :  { %v1279_v41 = vpop.f32.mrf.mxu1 }
 0x37e   :  { %v1235_v30 = vpop.f32.mrf.mxu2 }
 0x37f   :  { %v1249_v31 = vpop.f32.mrf.mxu3  ;;  %v1236_v34 = vadd.f32 %v1672_v11, %v1235_v30 }
 0x381   :  { %v1250_v35 = vadd.f32 %v1249_v31, %v1236_v34 }
 0x383   :  { %v1264_v38 = vadd.f32 %v1263_v33, %v1250_v35 }
 0x385   :  { %v1278_v42 = vadd.f32 %v1277_v12, %v1264_v38 }
 0x386   :  { %v1237_v36 = vpop.f32.mrf.mxu2 }
 0x387   :  { %v1238_v37 = vadd.f32 %v1672_v11, %v1237_v36  ;;  %v1251_v60 = vpop.f32.mrf.mxu3 }
 0x389   :  { %v1252_v25 = vadd.f32 %v1251_v60, %v1238_v37 }
 0x38b   :  { %v1266_v40 = vadd.f32 %v1265_v39, %v1252_v25 }
 0x38d   :  { %v1280_v43 = vadd.f32 %v1279_v41, %v1266_v40 }
 0x38f   :  { %v1656_v44 = vpack.c.bf16 %v1280_v43, %v1278_v42 }
 0x391   :  { %1657 = vst [vmem:[%s2019_s9] sm:$0xff] %v1656_v44  }
 0x392   :  { %1290 = vsyncpa [#allocation3], 1 }
 0x393   :  { %1291 = vsyncpa [#allocation5], 1 }
 0x394   :  { %1292 = vsyncpa [#allocation8], 1 }

</bundles_post_ra>
